<compile_context>
chip_gen: v6e
topology: v6e:2x2x1
jax: 0.10.0
libtpu: 0.0.40
codegen_flags: <defaults>
</compile_context>

<pallas_src>
import functools
import math

import jax
import jax.numpy as jnp
from jax.experimental import pallas as pl
from jax.experimental.pallas import tpu as pltpu


def _round_up(x, m):
    return ((x + m - 1) // m) * m


def _tiling_for_device():
    """(bt_max, vmem_limit_bytes) per TPU generation (conservative fallback)."""
    try:
        kind = jax.devices()[0].device_kind.lower()
    except Exception:
        kind = ""
    if "v5" in kind or "v6" in kind:
        # 128 MiB physical VMEM: bigger tiles + raised scoped limit.
        return 512, 64 * 1024 * 1024
    # v7x (64 MiB physical) or unknown: stay conservative.
    return 256, 32 * 1024 * 1024


def _pick_l_chunk(seq_len):
    """Chunk of L processed per in-kernel matmul.

    Chunks must tile L exactly and (unless == L) be multiples of 16 so the
    in-kernel (BT, lc, E) -> (BT*lc, E) bf16 reshape stays sublane-aligned.
    """
    if seq_len <= 32:
        return seq_len
    for cand in (32, 16):
        if seq_len % cand == 0:
            return cand
    return seq_len


def _fit_bt(bt, seq_len, emb_dim, hp, l_chunk, vmem_limit):
    """Shrink the batch tile until the per-step VMEM footprint fits."""
    budget = int(vmem_limit * 0.6)

    def est(b):
        return (2 * b * (seq_len + 2) * emb_dim * 2   # x tile, double-buffered, bf16
                + 3 * emb_dim * hp * 2                # folded conv weight, bf16
                + 2 * b * hp * 2                      # out tile, double-buffered, bf16
                + b * l_chunk * hp * 4                # per-chunk matmul result, f32
                + b * hp * 4)                         # running max, f32

    while bt > 8 and est(bt) > budget:
        bt = _round_up(bt // 2, 8)
    return bt


def cnn_encoder_kernel(x_ref, w_ref, b_ref, o_ref, *, seq_len, l_chunk):
    # x_ref: (BT, L+2, E) bf16 -- per-sentence conv-padded embeddings (compact K)
    # w_ref: (3, E, Hp)   bf16 -- one (E, Hp) slab per conv tap
    # b_ref: (1, Hp)      f32  -- conv bias (applied after the max)
    # o_ref: (BT, Hp)     bf16
    bt, hp = o_ref.shape
    e = x_ref.shape[-1]

    w = w_ref[...]                                           # (3, E, Hp), small

    # Running max over L, folded into the chunk loop: never materializes the
    # full (BT*L, Hp) f32 conv output.
    pooled = jnp.full((bt, hp), -jnp.inf, dtype=jnp.float32)
    for t0 in range(0, seq_len, l_chunk):
        acc = jnp.zeros((bt * l_chunk, hp), dtype=jnp.float32)
        for k in range(3):
            # Tap k = sublane-shifted slice of the VMEM block (XLU work, cheap
            # next to the MXU); no tap leaks across sentences because the
            # conv zero-padding is per sentence (the +2 in L+2).
            xk = x_ref[:, t0 + k:t0 + k + l_chunk, :].reshape(bt * l_chunk, e)
            acc = acc + jnp.dot(xk, w[k], preferred_element_type=jnp.float32)
        pooled = jnp.maximum(pooled,
                             jnp.max(acc.reshape(bt, l_chunk, hp), axis=1))

    # Bias + ReLU AFTER the max (valid: bias const over t, ReLU monotone).
    o_ref[...] = jnp.maximum(pooled + b_ref[...], 0.0).astype(o_ref.dtype)


@jax.jit
def cnn_encoder_forward(word, posh, post, params):
    # --- Embedding lookups (gather stays in plain JAX glue; see TODO) ---
    x = jnp.concatenate(
        [
            jnp.take(params["word_emb"], word, axis=0),
            jnp.take(params["pos1_emb"], posh, axis=0),
            jnp.take(params["pos2_emb"], post, axis=0),
        ],
        axis=-1,
    ).astype(jnp.bfloat16)                                   # (B, L, E) bf16

    B, L, E = x.shape
    H = params["w_full"].shape[0]
    Hp = _round_up(H, 128)                                   # lane-dense output

    bt_max, vmem_limit = _tiling_for_device()
    l_chunk = _pick_l_chunk(L)
    # Adaptive batch tile: aim for >= ~8 grid steps, multiple of 8, minimal
    # tail padding, then shrink to the VMEM budget.
    BT = min(bt_max, max(8, _round_up(pl.cdiv(B, 8), 8)))
    BT = _fit_bt(BT, L, E, Hp, l_chunk, vmem_limit)
    Bp = _round_up(B, BT)
    n_steps = Bp // BT

    # Compact padded activations: batch pad + conv padding=1 in one pass.
    # No K (=3E) zero-padding is materialized in HBM.
    xp = jnp.pad(x, ((0, Bp - B), (1, 1), (0, 0)))           # (Bp, L+2, E)

    # Conv1d weight (H, E, 3) -> (3, E, Hp): one clean (E, Hp) slab per tap.
    w = jnp.transpose(params["w_full"], (2, 1, 0))           # (3, E, H)
    w = jnp.pad(w, ((0, 0), (0, 0), (0, Hp - H))).astype(jnp.bfloat16)
    bias = jnp.pad(params["bias"].reshape(1, H),
                   ((0, 0), (0, Hp - H))).astype(jnp.float32)

    kernel = functools.partial(cnn_encoder_kernel, seq_len=L, l_chunk=l_chunk)

    flops = 2 * Bp * L * (3 * E) * Hp
    bytes_accessed = (Bp * (L + 2) * E * 2     # x (bf16)
                      + 3 * E * Hp * 2         # w (bf16)
                      + Hp * 4                 # bias (f32)
                      + Bp * Hp * 2)           # out (bf16)

    out = pl.pallas_call(
        kernel,
        out_shape=jax.ShapeDtypeStruct((Bp, Hp), jnp.bfloat16),
        grid=(n_steps,),
        in_specs=[
            pl.BlockSpec((BT, L + 2, E), lambda b: (b, 0, 0)),
            pl.BlockSpec((3, E, Hp), lambda b: (0, 0, 0)),
            pl.BlockSpec((1, Hp), lambda b: (0, 0)),
        ],
        out_specs=pl.BlockSpec((BT, Hp), lambda b: (b, 0)),
        compiler_params=pltpu.CompilerParams(
            dimension_semantics=("parallel",),
            vmem_limit_bytes=vmem_limit,
        ),
        cost_estimate=pl.CostEstimate(flops=flops, transcendentals=0,
                                      bytes_accessed=bytes_accessed),
    )(xp, w, bias)

    # Strip batch / channel padding; module returns f32.
    return out[:B, :H].astype(jnp.float32)


def reference_forward(word, posh, post, params):
    # Pure-JAX f32 reference mirroring the PyTorch module exactly.
    x = jnp.concatenate(
        [
            jnp.take(params["word_emb"], word, axis=0),
            jnp.take(params["pos1_emb"], posh, axis=0),
            jnp.take(params["pos2_emb"], post, axis=0),
        ],
        axis=-1,
    ).astype(jnp.float32)                                    # (B, L, E)
    B, L, E = x.shape
    W = params["w_full"]                                     # (H, E, 3)
    H = W.shape[0]
    xp = jnp.pad(x, ((0, 0), (1, 1), (0, 0)))                # conv padding=1
    out = jnp.zeros((B, L, H), jnp.float32)
    for k in range(3):
        out = out + jnp.einsum("ble,eh->blh", xp[:, k:k + L], W[:, :, k].T)
    out = out + params["bias"]
    out = jnp.maximum(out, 0.0)
    return jnp.max(out, axis=1)                              # (B, H)


def make_params(key, vocab, max_length, word_dim, pos_dim, hidden):
    E = word_dim + 2 * pos_dim
    k = jax.random.split(key, 6)
    # word embedding table: [vocab rows, unk, blk(=zeros, padding_idx)]
    word_vec_mat = jax.random.normal(k[0], (vocab, word_dim), jnp.float32) * 0.1
    unk = jax.random.normal(k[1], (1, word_dim), jnp.float32) / math.sqrt(word_dim)
    blk = jnp.zeros((1, word_dim), jnp.float32)
    word_emb = jnp.concatenate([word_vec_mat, unk, blk], axis=0)   # (V+2, Dw)
    # position embeddings, padding_idx=0 -> row 0 zeroed
    pos1 = jax.random.normal(k[2], (2 * max_length, pos_dim), jnp.float32) * 0.1
    pos2 = jax.random.normal(k[3], (2 * max_length, pos_dim), jnp.float32) * 0.1
    pos1 = pos1.at[0].set(0.0)
    pos2 = pos2.at[0].set(0.0)
    # Conv1d(E, H, 3) params
    bound = 1.0 / math.sqrt(E * 3)
    w_full = jax.random.uniform(k[4], (hidden, E, 3), jnp.float32, -bound, bound)
    bias = jax.random.uniform(k[5], (hidden,), jnp.float32, -bound, bound)
    return {
        "word_emb": word_emb,
        "pos1_emb": pos1,
        "pos2_emb": pos2,
        "w_full": w_full,       # (H, E, 3), PyTorch Conv1d layout
        "bias": bias,           # (H,)
    }


if __name__ == "__main__":
    # Small shapes consistent with the module's forward.
    B, L = 2, 16                # batch, max_length
    VOCAB = 10
    WORD_DIM, POS_DIM = 32, 4   # embedding_dim E = 32 + 2*4 = 40
    HIDDEN = 32

    key = jax.random.PRNGKey(0)
    kp, kw, kh, kt = jax.random.split(key, 4)
    params = make_params(kp, VOCAB, L, WORD_DIM, POS_DIM, HIDDEN)

    word = jax.random.randint(kw, (B, L), 0, VOCAB + 2, dtype=jnp.int32)
    posh = jax.random.randint(kh, (B, L), 0, 2 * L, dtype=jnp.int32)
    post = jax.random.randint(kt, (B, L), 0, 2 * L, dtype=jnp.int32)

    out = cnn_encoder_forward(word, posh, post, params)
    out = jax.block_until_ready(out)

    ref = reference_forward(word, posh, post, params)
    assert out.shape == (B, HIDDEN)
    # Tolerance covers the bf16 MXU operands / bf16 output store (f32 accum).
    assert jnp.allclose(out, ref, rtol=2e-2, atol=2e-2), "mismatch vs reference"
    print("KERNEL_OK")
</pallas_src>

<mosaic_0001>
module attributes {stable_mosaic.version = 11 : i64} {
  func.func @cnn_encoder_kernel(%arg0: i32, %arg1: memref<8x18x40xbf16, #tpu.memory_space<vmem>>, %arg2: memref<3x40x128xbf16, #tpu.memory_space<vmem>>, %arg3: memref<1x128xf32, #tpu.memory_space<vmem>>, %arg4: memref<8x128xbf16, #tpu.memory_space<vmem>>) attributes {dimension_semantics = [#tpu.dimension_semantics<parallel>], iteration_bounds = array<i64: 1>, scalar_prefetch = 0 : i64, scratch_operands = 0 : i64, tpu.core_type = #tpu.core_type<tc>, window_params = [{transform_indices = @transform_0, window_bounds = array<i64: 8, 18, 40>}, {pipeline_mode = #tpu.pipeline_mode<synchronous>, transform_indices = @transform_1, window_bounds = array<i64: 3, 40, 128>}, {pipeline_mode = #tpu.pipeline_mode<synchronous>, transform_indices = @transform_2, window_bounds = array<i64: 1, 128>}, {transform_indices = @transform_3, window_bounds = array<i64: 8, 128>}]} {
    %c0 = arith.constant 0 : index
    %c0_0 = arith.constant 0 : index
    %c0_1 = arith.constant 0 : index
    %0 = vector.load %arg2[%c0, %c0_0, %c0_1] : memref<3x40x128xbf16, #tpu.memory_space<vmem>>, vector<3x40x128xbf16>
    %cst = arith.constant 0xFF800000 : f32
    %1 = vector.broadcast %cst : f32 to vector<8x128xf32>
    %cst_2 = arith.constant 0.000000e+00 : f32
    %2 = vector.broadcast %cst_2 : f32 to vector<128x128xf32>
    %c0_3 = arith.constant 0 : index
    %c0_4 = arith.constant 0 : index
    %c0_5 = arith.constant 0 : index
    %3 = vector.load %arg1[%c0_3, %c0_4, %c0_5] : memref<8x18x40xbf16, #tpu.memory_space<vmem>>, vector<8x16x40xbf16>
    %4 = vector.shape_cast %3 : vector<8x16x40xbf16> to vector<128x40xbf16>
    %5 = vector.extract_strided_slice %0 {offsets = [0, 0, 0], sizes = [1, 40, 128], strides = [1, 1, 1]} : vector<3x40x128xbf16> to vector<1x40x128xbf16>
    %6 = vector.shape_cast %5 : vector<1x40x128xbf16> to vector<40x128xbf16>
    %cst_6 = arith.constant dense<0.000000e+00> : vector<128x128xf32>
    %7 = tpu.matmul %4, %6, %cst_6 {dimension_numbers = #tpu.dot_dimension_numbers<[1], [0], [0], [1], [0, 0, 1, 1], [], []>} : vector<128x40xbf16>, vector<40x128xbf16>, vector<128x128xf32> -> vector<128x128xf32>
    %8 = arith.addf %2, %7 : vector<128x128xf32>
    %c0_7 = arith.constant 0 : index
    %c1 = arith.constant 1 : index
    %c0_8 = arith.constant 0 : index
    %9 = vector.load %arg1[%c0_7, %c1, %c0_8] : memref<8x18x40xbf16, #tpu.memory_space<vmem>>, vector<8x16x40xbf16>
    %10 = vector.shape_cast %9 : vector<8x16x40xbf16> to vector<128x40xbf16>
    %11 = vector.extract_strided_slice %0 {offsets = [1, 0, 0], sizes = [1, 40, 128], strides = [1, 1, 1]} : vector<3x40x128xbf16> to vector<1x40x128xbf16>
    %12 = vector.shape_cast %11 : vector<1x40x128xbf16> to vector<40x128xbf16>
    %cst_9 = arith.constant dense<0.000000e+00> : vector<128x128xf32>
    %13 = tpu.matmul %10, %12, %cst_9 {dimension_numbers = #tpu.dot_dimension_numbers<[1], [0], [0], [1], [0, 0, 1, 1], [], []>} : vector<128x40xbf16>, vector<40x128xbf16>, vector<128x128xf32> -> vector<128x128xf32>
    %14 = arith.addf %8, %13 : vector<128x128xf32>
    %c0_10 = arith.constant 0 : index
    %c2 = arith.constant 2 : index
    %c0_11 = arith.constant 0 : index
    %15 = vector.load %arg1[%c0_10, %c2, %c0_11] : memref<8x18x40xbf16, #tpu.memory_space<vmem>>, vector<8x16x40xbf16>
    %16 = vector.shape_cast %15 : vector<8x16x40xbf16> to vector<128x40xbf16>
    %17 = vector.extract_strided_slice %0 {offsets = [2, 0, 0], sizes = [1, 40, 128], strides = [1, 1, 1]} : vector<3x40x128xbf16> to vector<1x40x128xbf16>
    %18 = vector.shape_cast %17 : vector<1x40x128xbf16> to vector<40x128xbf16>
    %cst_12 = arith.constant dense<0.000000e+00> : vector<128x128xf32>
    %19 = tpu.matmul %16, %18, %cst_12 {dimension_numbers = #tpu.dot_dimension_numbers<[1], [0], [0], [1], [0, 0, 1, 1], [], []>} : vector<128x40xbf16>, vector<40x128xbf16>, vector<128x128xf32> -> vector<128x128xf32>
    %20 = arith.addf %14, %19 : vector<128x128xf32>
    %21 = vector.shape_cast %20 : vector<128x128xf32> to vector<8x16x128xf32>
    %cst_13 = arith.constant dense<0xFF800000> : vector<8x128xf32>
    %22 = vector.multi_reduction <maximumf>, %21, %cst_13 [1] : vector<8x16x128xf32> to vector<8x128xf32>
    %23 = arith.maximumf %1, %22 : vector<8x128xf32>
    %c0_14 = arith.constant 0 : index
    %c0_15 = arith.constant 0 : index
    %24 = vector.load %arg3[%c0_14, %c0_15] : memref<1x128xf32, #tpu.memory_space<vmem>>, vector<1x128xf32>
    %25 = vector.broadcast %24 : vector<1x128xf32> to vector<8x128xf32>
    %26 = arith.addf %23, %25 : vector<8x128xf32>
    %cst_16 = arith.constant 0.000000e+00 : f32
    %27 = vector.broadcast %cst_16 : f32 to vector<8x128xf32>
    %28 = arith.maximumf %26, %27 : vector<8x128xf32>
    %29 = arith.truncf %28 : vector<8x128xf32> to vector<8x128xbf16>
    %c0_17 = arith.constant 0 : index
    %c0_18 = arith.constant 0 : index
    %30 = vector.load %arg4[%c0_17, %c0_18] : memref<8x128xbf16, #tpu.memory_space<vmem>>, vector<8x128xbf16>
    tpu.vector_store %arg4[%c0_17, %c0_18], %29 {strides = array<i32>} : memref<8x128xbf16, #tpu.memory_space<vmem>>, vector<8x128xbf16>,
    return
  }
  func.func @transform_0(%arg0: i32) -> (i32, i32, i32) {
    %c0_i32 = arith.constant 0 : i32
    %c0_i32_0 = arith.constant 0 : i32
    %c0_i32_1 = arith.constant 0 : i32
    return %arg0, %c0_i32, %c0_i32_0 : i32, i32, i32
  }
  func.func @transform_1(%arg0: i32) -> (i32, i32, i32) {
    %c0_i32 = arith.constant 0 : i32
    %c0_i32_0 = arith.constant 0 : i32
    %c0_i32_1 = arith.constant 0 : i32
    %c0_i32_2 = arith.constant 0 : i32
    return %c0_i32, %c0_i32_0, %c0_i32_1 : i32, i32, i32
  }
  func.func @transform_2(%arg0: i32) -> (i32, i32) {
    %c0_i32 = arith.constant 0 : i32
    %c0_i32_0 = arith.constant 0 : i32
    %c0_i32_1 = arith.constant 0 : i32
    return %c0_i32, %c0_i32_0 : i32, i32
  }
  func.func @transform_3(%arg0: i32) -> (i32, i32) {
    %c0_i32 = arith.constant 0 : i32
    %c0_i32_0 = arith.constant 0 : i32
    return %arg0, %c0_i32 : i32, i32
  }
}

</mosaic_0001>

<bundles_post_ra>
// kernel: cnn_encoder_forward.1
= control target key start
LH: loop header
LB: loop body
LE: loop exit
PB: predicated region body
PF: predicated region fallthrough
CT: control target
= control target key end

     0   :  { %vm313_vm0 = vcmask 1043456   ;;  %vm54_vm1 = vsmask.f32 3328  ;;  %vm55_vm2 = vsmask.f32 7440  ;;  %vm288_vm3 = vcmask 326656   ;;  %s1625_s1 = inlined_call_operand.vmem [shape: bf16[3,40,128], index: 1, kind: input, shape index: {}]   ;;  %s1626_s0 = inlined_call_operand.vmem [shape: bf16[8,18,40], index: 0, kind: input, shape index: {}]   ;;  %s1627_s2 = inlined_call_operand.vmem [shape: f32[1,128], index: 2, kind: input, shape index: {}]   ;;  %s1628_s3 = inlined_call_operand.vmem [shape: bf16[8,128], index: 3, kind: output, shape index: {}]  }
   0x1   :  { %v1193_v0 = vld [vmem:[%s1625_s1 + $0x24] ss:$0 sps:$4 sm:$0xff]   ;;  %v1194_v1 = vld [vmem:[%s1625_s1 + $0x1c] sm:$0xff]   ;;  %v1252_v5 = vld [vmem:[%s1626_s0 + $0x8] sm:$0x1]  ;;  %vm617_vm5 = vcmask 1042432  }
   0x2   :  { %1189 = vmatprep.subr.msk.bf16.mxu0 %vm313_vm0, %v1193_v0  ;;  %1190 = vmatprep.subr.msk.bf16.mxu1 %vm313_vm0, %v1193_v0  ;;  %v315_v2 = vsel %vm313_vm0, %v1193_v0, 0  ;;  %v1242_v3 = vld [vmem:[%s1626_s0] sm:$0xf]  ;;  %v1247_v4 = vld [vmem:[%s1626_s0 + $0x4] sm:$0xf]  ;;  %v1195_v8 = vld [vmem:[%s1625_s1 + $0x14] sm:$0xff]  }
   0x3   :  { %1118 = vmatpush3.bf16.msra.mxu0 %v315_v2  ;;  %1186 = vmatpush3.bf16.msra.mxu1 %v315_v2  ;;  %v58_v6 = vshrl.u32 %v1242_v3, 16  ;;  %v61_v7 = vshll.u32 %v1242_v3, 16  ;;  %v67_v9 = vshll.u32 %v1247_v4, 16  ;;  %v71_v10 = vshrl.u32 %v1247_v4, 16  ;;  %v1265_v12 = vld [vmem:[%s1626_s0 + $0x30] sm:$0xf]  ;;  %vm1289_vm4 = vmor %vm54_vm1, %vm55_vm2 }
   0x4   :  { %1119 = vmatprep.subr.bf16.mxu0 %v1194_v1  ;;  %1184 = vmatprep.subr.bf16.mxu1 %v1194_v1  ;;  %v77_v11 = vshll.u32 %v1252_v5, 16  ;;  %v1270_v15 = vld [vmem:[%s1626_s0 + $0x34] sm:$0xf]  ;;  %v1275_v16 = vld [vmem:[%s1626_s0 + $0x38] sm:$0x1]  ;;  %v625_v19 = vrot.slane %v1252_v5, 5 }
   0x5   :  { %v60_v13 = vrot.slane %v58_v6, 4  ;;  %v63_v14 = vrot.slane %v61_v7, 5  ;;  %v69_v17 = vrot.slane %v67_v9, 5  ;;  %v73_v18 = vrot.slane %v71_v10, 4  ;;  %v1285_v25 = vld [vmem:[%s1626_s0 + $0xc] sm:$0xf] }
   0x6   :  { %v154_v20 = vshrl.u32 %v1265_v12, 16  ;;  %v157_v22 = vshll.u32 %v1265_v12, 16  ;;  %v163_v23 = vshll.u32 %v1270_v15, 16  ;;  %v167_v24 = vshrl.u32 %v1270_v15, 16  ;;  %v1297_v31 = vld [vmem:[%s1626_s0 + $0x10] sm:$0xf] }
   0x7   :  { %1120 = vmatpush3.bf16.msra.mxu0 %v1194_v1  ;;  %1187 = vmatpush3.bf16.msra.mxu1 %v1194_v1  ;;  %v64_v21 = vor.u32 %v63_v14, %v60_v13  ;;  %v74_v27 = vor.u32 %v73_v18, %v69_v17  ;;  %v79_v28 = vrot.slane %v77_v11, 5  ;;  %v173_v30 = vshll.u32 %v1275_v16, 16  ;;  %v1302_v38 = vld [vmem:[%s1626_s0 + $0x14] sm:$0x1]  ;;  %v1312_v45 = vld [vmem:[%s1626_s0 + $0x3c] sm:$0xf] }
   0x8   :  { %1121 = vmatprep.subr.bf16.mxu0 %v1195_v8  ;;  %1185 = vmatprep.subr.bf16.mxu1 %v1195_v8  ;;  %v156_v29 = vrot.slane %v154_v20, 4  ;;  %v159_v33 = vrot.slane %v157_v22, 5  ;;  %v165_v34 = vrot.slane %v163_v23, 5  ;;  %v169_v35 = vrot.slane %v167_v24, 4  ;;  %v1320_v50 = vld [vmem:[%s1626_s0 + $0x40] sm:$0xf] }
   0x9   :  { %v65_v32 = vrot.slane %v64_v21, 4  ;;  %v75_v36 = vrot.slane %v74_v27, 4  ;;  %v175_v37 = vrot.slane %v173_v30, 5  ;;  %v82_v39 = vshrl.u32 %v1285_v25, 16  ;;  %v1196_v51 = vld [vmem:[%s1625_s1 + $0x10] ss:$0 sps:$4 sm:$0xff]  }
   0xa   :  { %v85_v40 = vshll.u32 %v1285_v25, 16  ;;  %v160_v42 = vor.u32 %v159_v33, %v156_v29  ;;  %v170_v43 = vor.u32 %v169_v35, %v165_v34  ;;  %v91_v44 = vshll.u32 %v1297_v31, 16  ;;  %v1329_v59 = vld [vmem:[%s1626_s0 + $0x44] sm:$0x1]  ;;  %v1197_v60 = vld [vmem:[%s1625_s1 + $0x38] ss:$0 sps:$4 sm:$0xff]  }
   0xb   :  { %1122 = vmatpush3.bf16.msra.mxu0 %v1195_v8  ;;  %1188 = vmatpush3.bf16.msra.mxu1 %v1195_v8  ;;  %v70_v41 = vsel %vm1289_vm4, %v65_v32, %v69_v17  ;;  %v80_v46 = vsel %vm1289_vm4, %v75_v36, %v79_v28  ;;  %v84_v47 = vrot.slane %v82_v39, 4  ;;  %v95_v49 = vshrl.u32 %v1297_v31, 16  ;;  %v1349_v13 = vld [vmem:[%s1626_s0 + $0x18] sm:$0xf]  ;;  %v1359_v21 = vld [vmem:[%s1626_s0 + $0x1c] sm:$0xf] }
   0xc   :  { %v87_v48 = vrot.slane %v85_v40, 5  ;;  %v1002_v52 = vcombine.low %v70_v41, %v80_v46  ;;  %v161_v53 = vrot.slane %v160_v42, 4  ;;  %v171_v54 = vrot.slane %v170_v43, 4  ;;  %1191 = vmatprep.subr.msk.bf16.mxu1 %vm313_vm0, %v1196_v51  ;;  %1192 = vmatprep.subr.msk.bf16.mxu0 %vm313_vm0, %v1197_v60  ;;  %v1365_v28 = vld [vmem:[%s1626_s0 + $0x20] sm:$0x1]  ;;  %v1199_v40 = vld [vmem:[%s1625_s1 + $0x30] sm:$0xff]  }
   0xd   :  { %v93_v55 = vrot.slane %v91_v44, 5  ;;  %v97_v57 = vrot.slane %v95_v49, 4  ;;  %v101_v58 = vshll.u32 %v1302_v38, 16  ;;  %v629_v63 = vrot.slane %v1297_v31, 5  ;;  %v1385_v46 = vld [vmem:[%s1626_s0 + $0x4c] sm:$0xf] }
   0xe   :  { %v88_v56 = vor.u32 %v87_v48, %v84_v47  ;;  %1123 = vmatprep.mubr.msk.bf16.mxu0 %vm288_vm3, %v1002_v52  ;;  %v166_v61 = vsel %vm1289_vm4, %v161_v53, %v165_v34  ;;  %v176_v62 = vsel %vm1289_vm4, %v171_v54, %v175_v37  ;;  %v178_v0 = vshrl.u32 %v1312_v45, 16  ;;  %v1374_v34 = vld [vmem:[%s1626_s0 + $0x48] sm:$0xf] }
   0xf   :  { %v1006_v1 = vcombine.low %v166_v61, %v176_v62  ;;  %v98_v6 = vor.u32 %v97_v57, %v93_v55  ;;  %v103_v7 = vrot.slane %v101_v58, 5  ;;  %v181_v9 = vshll.u32 %v1312_v45, 16  ;;  %v1198_v53 = vld [vmem:[%s1625_s1 + $0x8] sm:$0xff]   ;;  %v1401_v58 = vld [vmem:[%s1626_s0 + $0x24] sm:$0xf] }
  0x10   :  { %v89_v2 = vrot.slane %v88_v56, 4  ;;  %v180_v8 = vrot.slane %v178_v0, 4  ;;  %v187_v10 = vshll.u32 %v1320_v50, 16  ;;  %v191_v11 = vshrl.u32 %v1320_v50, 16 }
  0x11   :  { %1131 = vmatprep.mubr.msk.bf16.mxu1 %vm288_vm3, %v1006_v1  ;;  %v99_v17 = vrot.slane %v98_v6, 4  ;;  %v197_v18 = vshll.u32 %v1329_v59, 16  ;;  %v494_v20 = vsel %vm313_vm0, %v1196_v51, 0  ;;  %v183_v22 = vrot.slane %v181_v9, 5  ;;  %v1391_v51 = vld [vmem:[%s1626_s0 + $0x50] sm:$0x1] }
  0x12   :  { %v94_v14 = vsel %vm1289_vm4, %v89_v2, %v93_v55  ;;  %v189_v23 = vrot.slane %v187_v10, 5  ;;  %v193_v24 = vrot.slane %v191_v11, 4  ;;  %v740_v27 = vsel %vm313_vm0, %v1197_v60, 0  ;;  %v1201_v60 = vld [vmem:[%s1625_s1 + $0x28] sm:$0xff]  }
  0x13   :  { %v104_v29 = vsel %vm1289_vm4, %v99_v17, %v103_v7  ;;  %v199_v30 = vrot.slane %v197_v18, 5  ;;  %v106_v32 = vshrl.u32 %v1349_v13, 16  ;;  %v109_v33 = vshll.u32 %v1349_v13, 16  ;;  %v1414_v2 = vld [vmem:[%s1626_s0 + $0x28] sm:$0xf] }
  0x14   :  { %v1003_v35 = vcombine.low %v94_v14, %v104_v29  ;;  %v184_v36 = vor.u32 %v183_v22, %v180_v8  ;;  %v194_v37 = vor.u32 %v193_v24, %v189_v23  ;;  %v115_v39 = vshll.u32 %v1359_v21, 16  ;;  %v1419_v10 = vld [vmem:[%s1626_s0 + $0x2c] sm:$0x1] }
  0x15   :  { %v108_v41 = vrot.slane %v106_v32, 4  ;;  %v111_v42 = vrot.slane %v109_v33, 5  ;;  %v119_v43 = vshrl.u32 %v1359_v21, 16  ;;  %v125_v44 = vshll.u32 %v1365_v28, 16 }
  0x16   :  { %1124 = vmatmul.mubr.msk.bf16.vlgmr.msra.gmra.mxu0 %vm288_vm3, %v1003_v35  ;;  %v185_v47 = vrot.slane %v184_v36, 4  ;;  %v195_v48 = vrot.slane %v194_v37, 4  ;;  %v117_v49 = vrot.slane %v115_v39, 5  ;;  %v202_v52 = vshrl.u32 %v1374_v34, 16  ;;  %v1432_v35 = vld [vmem:[%s1626_s0 + $0x54] sm:$0xf] }
  0x17   :  { %1162 = vmatpush3.bf16.msra.mxu0 %v740_v27  ;;  %v112_v54 = vor.u32 %v111_v42, %v108_v41  ;;  %v121_v55 = vrot.slane %v119_v43, 4  ;;  %v127_v56 = vrot.slane %v125_v44, 5  ;;  %v205_v57 = vshll.u32 %v1374_v34, 16  ;;  %v1200_v41 = vld [vmem:[%s1625_s1] sm:$0xff]  }
  0x18   :  { %v190_v61 = vsel %vm1289_vm4, %v185_v47, %v189_v23  ;;  %v200_v62 = vsel %vm1289_vm4, %v195_v48, %v199_v30  ;;  %v204_v0 = vrot.slane %v202_v52, 4  ;;  %v211_v1 = vshll.u32 %v1385_v46, 16  ;;  %1163 = vmatprep.subr.bf16.mxu0 %v1199_v40 }
  0x19   :  { %v1007_v6 = vcombine.low %v190_v61, %v200_v62  ;;  %v113_v7 = vrot.slane %v112_v54, 4  ;;  %v122_v8 = vor.u32 %v121_v55, %v117_v49  ;;  %v207_v9 = vrot.slane %v205_v57, 5  ;;  %v1451_v54 = vld [vmem:[%s1626_s0 + $0x5c] sm:$0x1] }
  0x1a   :  { %v213_v11 = vrot.slane %v211_v1, 5  ;;  %v215_v14 = vshrl.u32 %v1385_v46, 16  ;;  %v221_v17 = vshll.u32 %v1391_v51, 16  ;;  %v130_v18 = vshrl.u32 %v1401_v58, 16 }
  0x1b   :  { %1132 = vmatmul.mubr.msk.bf16.vlgmr.msra.gmra.mxu1 %vm288_vm3, %v1007_v6  ;;  %v118_v22 = vsel %vm1289_vm4, %v113_v7, %v117_v49  ;;  %v123_v23 = vrot.slane %v122_v8, 4  ;;  %v208_v24 = vor.u32 %v207_v9, %v204_v0  ;;  %v133_v27 = vshll.u32 %v1401_v58, 16  ;;  %1164 = vmatpush3.bf16.msra.mxu0 %v1199_v40  ;;  %v593_v8 = vld [vmem:[%s1626_s0] sm:$0xe] }
  0x1c   :  { %1140 = vmatpush3.bf16.msra.mxu1 %v494_v20  ;;  %v217_v29 = vrot.slane %v215_v14, 4  ;;  %v223_v30 = vrot.slane %v221_v17, 5  ;;  %v132_v32 = vrot.slane %v130_v18, 4  ;;  %v139_v33 = vshll.u32 %v1414_v2, 16  ;;  %1165 = vmatprep.subr.bf16.mxu0 %v1201_v60  ;;  %v1440_v20 = vld [vmem:[%s1626_s0 + $0x58] sm:$0xf] }
  0x1d   :  { %1141 = vmatprep.subr.bf16.mxu1 %v1198_v53  ;;  %v128_v36 = vsel %vm1289_vm4, %v123_v23, %v127_v56  ;;  %v209_v37 = vrot.slane %v208_v24, 4  ;;  %v135_v39 = vrot.slane %v133_v27, 5  ;;  %v143_v40 = vshrl.u32 %v1414_v2, 16  ;;  %v594_v23 = vld [vmem:[%s1626_s0 + $0xc] sm:$0xe] }
  0x1e   :  { %v1004_v42 = vcombine.low %v118_v22, %v128_v36  ;;  %v218_v43 = vor.u32 %v217_v29, %v213_v11  ;;  %v141_v44 = vrot.slane %v139_v33, 5  ;;  %v149_v47 = vshll.u32 %v1419_v10, 16 }
  0x1f   :  { %v214_v48 = vsel %vm1289_vm4, %v209_v37, %v213_v11  ;;  %v136_v49 = vor.u32 %v135_v39, %v132_v32  ;;  %v145_v52 = vrot.slane %v143_v40, 4  ;;  %v226_v55 = vshrl.u32 %v1432_v35, 16  ;;  %1166 = vmatpush3.bf16.msra.mxu0 %v1201_v60 }
  0x20   :  { %1127 = vmatprep.mubr.msk.bf16.mxu0 %vm288_vm3, %v1004_v42  ;;  %v219_v56 = vrot.slane %v218_v43, 4  ;;  %1142 = vmatpush3.bf16.msra.mxu1 %v1198_v53  ;;  %v151_v57 = vrot.slane %v149_v47, 5  ;;  %v229_v61 = vshll.u32 %v1432_v35, 16  ;;  %v235_v62 = vshll.u32 %v1440_v20, 16 }
  0x21   :  { %v137_v0 = vrot.slane %v136_v49, 4  ;;  %v146_v1 = vor.u32 %v145_v52, %v141_v44  ;;  %v228_v6 = vrot.slane %v226_v55, 4  ;;  %v239_v7 = vshrl.u32 %v1440_v20, 16  ;;  %1143 = vmatprep.subr.bf16.mxu1 %v1200_v41 }
  0x22   :  { %v224_v60 = vsel %vm1289_vm4, %v219_v56, %v223_v30  ;;  %v231_v9 = vrot.slane %v229_v61, 5  ;;  %v237_v53 = vrot.slane %v235_v62, 5  ;;  %v245_v11 = vshll.u32 %v1451_v54, 16 }
  0x23   :  { %v1008_v14 = vcombine.low %v214_v48, %v224_v60  ;;  %v142_v17 = vsel %vm1289_vm4, %v137_v0, %v141_v44  ;;  %v147_v18 = vrot.slane %v146_v1, 4  ;;  %v241_v22 = vrot.slane %v239_v7, 4 }
  0x24   :  { %v632_v24 = vrot.slane %v1302_v38, 5  ;;  %v232_v27 = vor.u32 %v231_v9, %v228_v6  ;;  %1144 = vmatpush3.bf16.msra.mxu1 %v1200_v41  ;;  %vm618_vm6 = vcmask 1046532   ;;  %v1040_v29 = vrot.slane %v593_v8, 9  ;;  %v595_v38 = vld [vmem:[%s1626_s0 + $0x18] sm:$0xe] }
  0x25   :  { %1135 = vmatprep.mubr.msk.bf16.mxu1 %vm288_vm3, %v1008_v14  ;;  %v152_v30 = vsel %vm1289_vm4, %v147_v18, %v151_v57  ;;  %v242_v32 = vor.u32 %v241_v22, %v237_v53  ;;  %v247_v33 = vrot.slane %v245_v11, 5  ;;  %vm1474_vm7 = vmor %vm617_vm5, %vm618_vm6  ;;  %v622_v37 = vrot.slane %v1247_v4, 5 }
  0x26   :  { %v1005_v39 = vcombine.low %v142_v17, %v152_v30  ;;  %v233_v40 = vrot.slane %v232_v27, 4  ;;  %v1041_v41 = vrot.slane %v594_v23, 9  ;;  %v631_v42 = vrot.slane %v629_v63, 4 }
  0x27   :  { %v243_v43 = vrot.slane %v242_v32, 4  ;;  %v623_v44 = vsel %vm1474_vm7, %v1040_v29, %v622_v37  ;;  %v624_v47 = vrot.slane %v622_v37, 4  ;;  %v1021_v49 = vcombine.low %v1242_v3, %v1247_v4 }
  0x28   :  { %1128 = vmatmul.mubr.msk.bf16.gmra.mxu0 %vm288_vm3, %v1005_v39  ;;  %v238_v48 = vsel %vm1289_vm4, %v233_v40, %v237_v53  ;;  %v630_v52 = vsel %vm1474_vm7, %v1041_v41, %v629_v63  ;;  %v1042_v55 = vrot.slane %v595_v38, 9  ;;  %v633_v61 = vsel %vm1474_vm7, %v631_v42, %v632_v24  ;;  %v596_v63 = vld [vmem:[%s1626_s0 + $0x24] sm:$0xe] }
  0x29   :  { %v248_v56 = vsel %vm1289_vm4, %v243_v43, %v247_v33  ;;  %v626_v57 = vsel %vm1474_vm7, %v624_v47, %v625_v19  ;;  %v636_v62 = vrot.slane %v1359_v21, 5  ;;  %v639_v0 = vrot.slane %v1365_v28, 5  ;;  %v597_v19 = vld [vmem:[%s1626_s0 + $0x30] sm:$0xe] }
  0x2a   :  { %v1009_v3 = vcombine.low %v238_v48, %v248_v56  ;;  %v1048_v4 = vcombine.low %v623_v44, %v626_v57  ;;  %v643_v1 = vrot.slane %v1414_v2, 5  ;;  %v1049_v6 = vcombine.low %v630_v52, %v633_v61 }
  0x2b   :  { %v637_v26 = vsel %vm1474_vm7, %v1042_v55, %v636_v62  ;;  %v638_v5 = vrot.slane %v636_v62, 4  ;;  %v650_v28 = vrot.slane %v1270_v15, 5  ;;  %v1043_v8 = vrot.slane %v596_v63, 9 }
  0x2c   :  { %1136 = vmatmul.mubr.msk.bf16.gmra.mxu1 %vm288_vm3, %v1009_v3  ;;  %1167 = vmatprep.mubr.msk.bf16.mxu0 %vm288_vm3, %v1048_v4  ;;  %v645_v60 = vrot.slane %v643_v1, 4  ;;  %v646_v9 = vrot.slane %v1419_v10, 5  ;;  %v653_v53 = vrot.slane %v1275_v16, 5  ;;  %v1044_v14 = vrot.slane %v597_v19, 9 }
  0x2d   :  { %1145 = vmatprep.mubr.msk.bf16.mxu1 %vm288_vm3, %v1021_v49  ;;  %v640_v7 = vsel %vm1474_vm7, %v638_v5, %v639_v0  ;;  %v652_v17 = vrot.slane %v650_v28, 4  ;;  %v1022_v18 = vcombine.low %v1285_v25, %v1297_v31  ;;  %v1023_v22 = vcombine.low %v1349_v13, %v1359_v21  ;;  %v598_v31 = vld [vmem:[%s1626_s0 + $0x3c] sm:$0xe]  ;;  %v599_v21 = vld [vmem:[%s1626_s0 + $0x48] sm:$0xe] }
  0x2e   :  { %v1050_v11 = vcombine.low %v637_v26, %v640_v7  ;;  %v644_v23 = vsel %vm1474_vm7, %v1043_v8, %v643_v1  ;;  %v647_v10 = vsel %vm1474_vm7, %v645_v60, %v646_v9  ;;  %v657_v16 = vrot.slane %v1320_v50, 5 }
  0x2f   :  { %v651_v24 = vsel %vm1474_vm7, %v1044_v14, %v650_v28  ;;  %v654_v25 = vsel %vm1474_vm7, %v652_v17, %v653_v53  ;;  %v664_v13 = vrot.slane %v1385_v46, 5  ;;  %v1051_v27 = vcombine.low %v644_v23, %v647_v10 }
  0x30   :  { %1168 = vmatmul.mubr.msk.bf16.vlgmr.msra.gmra.mxu0 %vm288_vm3, %v1049_v6  ;;  %v1052_v29 = vcombine.low %v651_v24, %v654_v25  ;;  %v1045_v30 = vrot.slane %v598_v31, 9  ;;  %v659_v32 = vrot.slane %v657_v16, 4  ;;  %v660_v33 = vrot.slane %v1329_v59, 5 }
  0x31   :  { %1171 = vmatprep.mubr.msk.bf16.mxu0 %vm288_vm3, %v1050_v11  ;;  %v1046_v37 = vrot.slane %v599_v21, 9  ;;  %v666_v38 = vrot.slane %v664_v13, 4  ;;  %v667_v39 = vrot.slane %v1391_v51, 5  ;;  %v1024_v40 = vcombine.low %v1401_v58, %v1414_v2 }
  0x32   :  { %v1025_v41 = vcombine.low %v1265_v12, %v1270_v15  ;;  %v658_v42 = vsel %vm1474_vm7, %v1045_v30, %v657_v16  ;;  %v661_v59 = vsel %vm1474_vm7, %v659_v32, %v660_v33  ;;  %v671_v43 = vrot.slane %v1440_v20, 5  ;;  %v600_v12 = vld [vmem:[%s1626_s0 + $0x54] sm:$0xe] }
  0x33   :  { %v665_v51 = vsel %vm1474_vm7, %v1046_v37, %v664_v13  ;;  %v668_v58 = vsel %vm1474_vm7, %v666_v38, %v667_v39  ;;  %v1053_v15 = vcombine.low %v658_v42, %v661_v59  ;;  %v1047_v44 = vrot.slane %v600_v12, 9 }
  0x34   :  { %1146 = vmatmul.mubr.msk.bf16.vlgmr.msra.gmra.mxu1 %vm288_vm3, %v1022_v18  ;;  %v1054_v2 = vcombine.low %v665_v51, %v668_v58  ;;  %v673_v47 = vrot.slane %v671_v43, 4  ;;  %v674_v48 = vrot.slane %v1451_v54, 5  ;;  %v1026_v49 = vcombine.low %v1312_v45, %v1320_v50 }
  0x35   :  { %1149 = vmatprep.mubr.msk.bf16.mxu1 %vm288_vm3, %v1023_v22  ;;  %v1027_v52 = vcombine.low %v1374_v34, %v1385_v46  ;;  %v672_v55 = vsel %vm1474_vm7, %v1047_v44, %v671_v43  ;;  %v1028_v45 = vcombine.low %v1432_v35, %v1440_v20  ;;  %vm975_vm8 = vcmask 1041409  }
  0x36   :  { %v675_v56 = vsel %vm1474_vm7, %v673_v47, %v674_v48  ;;  %vm978_vm9 = vcmask 1042434   ;;  %vm981_vm10 = vcmask 1043459   ;;  %vm984_vm11 = vcmask 1044484  }
  0x37   :  { %v1055_v57 = vcombine.low %v672_v55, %v675_v56  ;;  %vm987_vm12 = vcmask 1045509   ;;  %vm990_vm13 = vcmask 1046534   ;;  %vm993_vm14 = vcmask 1047559  }
  0x38   :  { %1172 = vmatmul.mubr.msk.bf16.gmra.mxu0 %vm288_vm3, %v1051_v27 }
  0x39   :  { %1175 = vmatprep.mubr.msk.bf16.mxu0 %vm288_vm3, %v1052_v29 }
  0x3c   :  { %1150 = vmatmul.mubr.msk.bf16.gmra.mxu1 %vm288_vm3, %v1024_v40 }
  0x3d   :  { %1153 = vmatprep.mubr.msk.bf16.mxu1 %vm288_vm3, %v1025_v41 }
  0x40   :  { %1176 = vmatmul.mubr.msk.bf16.gmra.mxu0 %vm288_vm3, %v1053_v15 }
  0x41   :  { %1179 = vmatprep.mubr.msk.bf16.mxu0 %vm288_vm3, %v1054_v2 }
  0x44   :  { %1154 = vmatmul.mubr.msk.bf16.gmra.mxu1 %vm288_vm3, %v1026_v49 }
  0x45   :  { %1157 = vmatprep.mubr.msk.bf16.mxu1 %vm288_vm3, %v1027_v52 }
  0x48   :  { %1180 = vmatmul.mubr.msk.bf16.gmra.mxu0 %vm288_vm3, %v1055_v57 }
  0x4c   :  { %1158 = vmatmul.mubr.msk.bf16.gmra.mxu1 %vm288_vm3, %v1028_v45 }
  0xd6   :  { %v1125_v50 = vpop.f32.mrf.mxu0 }
  0xd8   :  { %v351_v46 = vpop.f32.mrf.mxu0 }
  0xda   :  { %v1126_v36 = vpop.f32.mrf.mxu0 }
  0xdb   :  { %v1585_v34 = vpop.f32.mrf.mxu1 }
  0xdc   :  { %v354_v62 = vpop.f32.mrf.mxu0 }
  0xdd   :  { %v1587_v54 = vpop.f32.mrf.mxu1 }
  0xdf   :  { %v1589_v61 = vpop.f32.mrf.mxu1 }
  0xe1   :  { %v1591_v3 = vpop.f32.mrf.mxu1 }
  0xe8   :  { %v1129_v4 = vpop.f32.mrf.mxu0 }
  0xea   :  { %v367_v0 = vpop.f32.mrf.mxu0 }
  0xec   :  { %v1593_v63 = vpop.f32.mrf.mxu1  ;;  %v1130_v35 = vpop.f32.mrf.mxu0 }
  0xee   :  { %v1595_v20 = vpop.f32.mrf.mxu1  ;;  %v370_v26 = vpop.f32.mrf.mxu0 }
  0xf0   :  { %v1597_v5 = vpop.f32.mrf.mxu1  ;;  %v1169_v1 = vpop.f32.mrf.mxu0 }
  0xf2   :  { %v1599_v19 = vpop.f32.mrf.mxu1  ;;  %v776_v6 = vpop.f32.mrf.mxu0 }
  0xf4   :  { %v1147_v28 = vpop.f32.mrf.mxu1  ;;  %v1170_v7 = vpop.f32.mrf.mxu0 }
  0xf5   :  { %v539_v9 = vadd.f32 %v1147_v28, %v1125_v50 }
  0xf6   :  { %v530_v8 = vpop.f32.mrf.mxu1  ;;  %v779_v60 = vpop.f32.mrf.mxu0 }
  0xf7   :  { %v531_v14 = vadd.f32 %v530_v8, %v351_v46  ;;  %v841_v23 = vadd.f32 %v1169_v1, %v539_v9 }
  0xf8   :  { %v1148_v53 = vpop.f32.mrf.mxu1  ;;  %v1173_v11 = vpop.f32.mrf.mxu0 }
  0xf9   :  { %v542_v17 = vadd.f32 %v1148_v53, %v1126_v36  ;;  %v839_v31 = vadd.f32 %v776_v6, %v531_v14 }
  0xfa   :  { %v533_v18 = vpop.f32.mrf.mxu1  ;;  %v792_v22 = vpop.f32.mrf.mxu0 }
  0xfb   :  { %v842_v10 = vadd.f32 %v1170_v7, %v542_v17  ;;  %v534_v16 = vadd.f32 %v533_v18, %v354_v62 }
  0xfc   :  { %v1151_v24 = vpop.f32.mrf.mxu1  ;;  %v1174_v25 = vpop.f32.mrf.mxu0 }
  0xfd   :  { %v862_v13 = vmax.f32 %v841_v23, %v842_v10  ;;  %v840_v21 = vadd.f32 %v779_v60, %v534_v16  ;;  %v555_v27 = vadd.f32 %v1151_v24, %v1129_v4 }
  0xfe   :  { %v546_v29 = vpop.f32.mrf.mxu1  ;;  %v795_v30 = vpop.f32.mrf.mxu0 }
  0xff   :  { %v863_v32 = vrot.slane %v862_v13, 4  ;;  %v855_v33 = vmax.f32 %v839_v31, %v840_v21  ;;  %v547_v41 = vadd.f32 %v546_v29, %v367_v0  ;;  %v845_v59 = vadd.f32 %v1173_v11, %v555_v27  ;;  %v1609_v31 = vld [vmem:[%s1627_s2] ss:$0 sm:$0xff] }
 0x100   :  { %v1152_v37 = vpop.f32.mrf.mxu1  ;;  %v1177_v38 = vpop.f32.mrf.mxu0 }
 0x101   :  { %v864_v39 = vmax.f32 %v862_v13, %v863_v32  ;;  %v856_v40 = vrot.slane %v855_v33, 4  ;;  %v558_v42 = vadd.f32 %v1152_v37, %v1130_v35  ;;  %v843_v48 = vadd.f32 %v792_v22, %v547_v41 }
 0x102   :  { %v549_v43 = vpop.f32.mrf.mxu1  ;;  %v808_v51 = vpop.f32.mrf.mxu0 }
 0x103   :  { %v865_v58 = vrot.slane %v864_v39, 2  ;;  %v857_v12 = vmax.f32 %v855_v33, %v856_v40  ;;  %v846_v15 = vadd.f32 %v1174_v25, %v558_v42  ;;  %v550_v2 = vadd.f32 %v549_v43, %v370_v26 }
 0x104   :  { %v1155_v44 = vpop.f32.mrf.mxu1  ;;  %v1178_v47 = vpop.f32.mrf.mxu0 }
 0x105   :  { %v876_v49 = vmax.f32 %v845_v59, %v846_v15  ;;  %v844_v52 = vadd.f32 %v795_v30, %v550_v2  ;;  %v866_v57 = vmax.f32 %v864_v39, %v865_v58  ;;  %v858_v45 = vrot.slane %v857_v12, 2 }
 0x106   :  { %v562_v55 = vpop.f32.mrf.mxu1  ;;  %v811_v56 = vpop.f32.mrf.mxu0  ;;  %v571_v36 = vadd.f32 %v1155_v44, %v1585_v34 }
 0x107   :  { %v877_v50 = vrot.slane %v876_v49, 4  ;;  %v869_v46 = vmax.f32 %v843_v48, %v844_v52  ;;  %v563_v1 = vadd.f32 %v562_v55, %v1587_v54  ;;  %v867_v28 = vrot.slane %v866_v57, 1 }
 0x108   :  { %v1156_v62 = vpop.f32.mrf.mxu1  ;;  %v1181_v35 = vpop.f32.mrf.mxu0  ;;  %v859_v7 = vmax.f32 %v857_v12, %v858_v45  ;;  %v849_v9 = vadd.f32 %v1177_v38, %v571_v36 }
 0x109   :  { %v878_v4 = vmax.f32 %v876_v49, %v877_v50  ;;  %v870_v0 = vrot.slane %v869_v46, 4  ;;  %v574_v26 = vadd.f32 %v1156_v62, %v1589_v61  ;;  %v847_v22 = vadd.f32 %v808_v51, %v563_v1 }
 0x10a   :  { %v565_v6 = vpop.f32.mrf.mxu1  ;;  %v824_v18 = vpop.f32.mrf.mxu0  ;;  %v868_v54 = vmax.f32 %v866_v57, %v867_v28  ;;  %v860_v24 = vrot.slane %v859_v7, 1 }
 0x10b   :  { %v879_v8 = vrot.slane %v878_v4, 2  ;;  %v871_v60 = vmax.f32 %v869_v46, %v870_v0  ;;  %v850_v53 = vadd.f32 %v1178_v47, %v574_v26  ;;  %v566_v11 = vadd.f32 %v565_v6, %v1591_v3 }
 0x10c   :  { %v1159_v14 = vpop.f32.mrf.mxu1  ;;  %v1182_v32 = vpop.f32.mrf.mxu0  ;;  %v861_v40 = vmax.f32 %v859_v7, %v860_v24 }
 0x10d   :  { %v880_v17 = vmax.f32 %v878_v4, %v879_v8  ;;  %v872_v34 = vrot.slane %v871_v60, 2  ;;  %v890_v23 = vmax.f32 %v849_v9, %v850_v53  ;;  %v848_v10 = vadd.f32 %v811_v56, %v566_v11 }
 0x10e   :  { %v578_v16 = vpop.f32.mrf.mxu1  ;;  %v587_v25 = vadd.f32 %v1159_v14, %v1593_v63  ;;  %v919_v63 = vadd.f32 %v1609_v31, %v868_v54  ;;  %v827_v2 = vpop.f32.mrf.mxu0  ;;  %v918_v52 = vadd.f32 %v1609_v31, %v861_v40 }
 0x10f   :  { %v873_v61 = vmax.f32 %v871_v60, %v872_v34  ;;  %v891_v13 = vrot.slane %v890_v23, 4  ;;  %v883_v3 = vmax.f32 %v847_v22, %v848_v10  ;;  %v881_v27 = vrot.slane %v880_v17, 1 }
 0x110   :  { %v1160_v21 = vpop.f32.mrf.mxu1  ;;  %v579_v30 = vadd.f32 %v578_v16, %v1595_v20  ;;  %v853_v42 = vadd.f32 %v1181_v35, %v587_v25  ;;  %v927_v49 = vmax.f32 %v919_v63, 0.0  ;;  %v926_v35 = vmax.f32 %v918_v52, 0.0 }
 0x111   :  { %v874_v29 = vrot.slane %v873_v61, 1  ;;  %v892_v33 = vmax.f32 %v890_v23, %v891_v13  ;;  %v884_v37 = vrot.slane %v883_v3, 4  ;;  %v590_v38 = vadd.f32 %v1160_v21, %v1597_v5 }
 0x112   :  { %v581_v39 = vpop.f32.mrf.mxu1  ;;  %v882_v12 = vmax.f32 %v880_v17, %v881_v27  ;;  %v851_v20 = vadd.f32 %v824_v18, %v579_v30  ;;  %v1077_v0 = vpack.c.bf16 %v927_v49, %v927_v49  ;;  %v1076_v14 = vpack.c.bf16 %v926_v35, %v926_v35 }
 0x113   :  { %v875_v41 = vmax.f32 %v873_v61, %v874_v29  ;;  %v893_v59 = vrot.slane %v892_v33, 2  ;;  %v885_v43 = vmax.f32 %v883_v3, %v884_v37  ;;  %v854_v51 = vadd.f32 %v1182_v32, %v590_v38 }
 0x114   :  { %v582_v58 = vadd.f32 %v581_v39, %v1599_v19  ;;  %v921_v50 = vadd.f32 %v1609_v31, %v882_v12  ;;  %v967_v11 = vunpack.c.l.b16 %v1077_v0  ;;  %v966_v25 = vunpack.c.l.b16 %v1076_v14 }
 0x115   :  { %v920_v15 = vadd.f32 %v1609_v31, %v875_v41  ;;  %v894_v44 = vmax.f32 %v892_v33, %v893_v59  ;;  %v886_v47 = vrot.slane %v885_v43, 2  ;;  %v904_v48 = vmax.f32 %v853_v42, %v854_v51 }
 0x116   :  { %v852_v5 = vadd.f32 %v827_v2, %v582_v58  ;;  %v929_v28 = vmax.f32 %v921_v50, 0.0  ;;  %v974_v61 = vrot.slane %v967_v11, 7 }
 0x117   :  { %v895_v55 = vrot.slane %v894_v44, 1  ;;  %v887_v56 = vmax.f32 %v885_v43, %v886_v47  ;;  %v905_v57 = vrot.slane %v904_v48, 4  ;;  %v928_v46 = vmax.f32 %v920_v15, 0.0 }
 0x118   :  { %v897_v45 = vmax.f32 %v851_v20, %v852_v5  ;;  %v1079_v23 = vpack.c.bf16 %v929_v28, %v929_v28  ;;  %v976_v37 = vsel %vm975_vm8, %v974_v61, %v966_v25 }
 0x119   :  { %v896_v19 = vmax.f32 %v894_v44, %v895_v55  ;;  %v888_v36 = vrot.slane %v887_v56, 1  ;;  %v906_v62 = vmax.f32 %v904_v48, %v905_v57  ;;  %v1078_v7 = vpack.c.bf16 %v928_v46, %v928_v46 }
 0x11a   :  { %v898_v4 = vrot.slane %v897_v45, 4  ;;  %v969_v29 = vunpack.c.l.b16 %v1079_v23 }
 0x11b   :  { %v889_v1 = vmax.f32 %v887_v56, %v888_v36  ;;  %v907_v26 = vrot.slane %v906_v62, 2  ;;  %v923_v8 = vadd.f32 %v1609_v31, %v896_v19  ;;  %v968_v18 = vunpack.c.l.b16 %v1078_v7 }
 0x11c   :  { %v899_v6 = vmax.f32 %v897_v45, %v898_v4  ;;  %v980_v41 = vrot.slane %v969_v29, 5 }
 0x11d   :  { %v922_v60 = vadd.f32 %v1609_v31, %v889_v1  ;;  %v908_v9 = vmax.f32 %v906_v62, %v907_v26  ;;  %v931_v10 = vmax.f32 %v923_v8, 0.0  ;;  %v977_v3 = vrot.slane %v968_v18, 6 }
 0x11e   :  { %v900_v53 = vrot.slane %v899_v6, 2 }
 0x11f   :  { %v930_v17 = vmax.f32 %v922_v60, 0.0  ;;  %v909_v34 = vrot.slane %v908_v9, 1  ;;  %v1081_v30 = vpack.c.bf16 %v931_v10, %v931_v10  ;;  %v979_v39 = vsel %vm978_vm9, %v977_v3, %v976_v37 }
 0x120   :  { %v901_v22 = vmax.f32 %v899_v6, %v900_v53  ;;  %v982_v43 = vsel %vm981_vm10, %v980_v41, %v979_v39 }
 0x121   :  { %v1080_v16 = vpack.c.bf16 %v930_v17, %v930_v17  ;;  %v910_v54 = vmax.f32 %v908_v9, %v909_v34  ;;  %v971_v42 = vunpack.c.l.b16 %v1081_v30 }
 0x122   :  { %v902_v24 = vrot.slane %v901_v22, 1 }
 0x123   :  { %v925_v13 = vadd.f32 %v1609_v31, %v910_v54  ;;  %v970_v21 = vunpack.c.l.b16 %v1080_v16  ;;  %v986_v15 = vrot.slane %v971_v42, 3 }
 0x124   :  { %v903_v27 = vmax.f32 %v901_v22, %v902_v24 }
 0x125   :  { %v933_v32 = vmax.f32 %v925_v13, 0.0  ;;  %v983_v63 = vrot.slane %v970_v21, 4 }
 0x126   :  { %v924_v33 = vadd.f32 %v1609_v31, %v903_v27 }
 0x127   :  { %v1083_v38 = vpack.c.bf16 %v933_v32, %v933_v32  ;;  %v985_v58 = vsel %vm984_vm11, %v983_v63, %v982_v43 }
 0x128   :  { %v932_v40 = vmax.f32 %v924_v33, 0.0  ;;  %v988_v2 = vsel %vm987_vm12, %v986_v15, %v985_v58 }
 0x129   :  { %v973_v51 = vunpack.c.l.b16 %v1083_v38 }
 0x12a   :  { %v1082_v59 = vpack.c.bf16 %v932_v40, %v932_v40 }
 0x12b   :  { %v992_v31 = vrot.slane %v973_v51, 1 }
 0x12c   :  { %v972_v12 = vunpack.c.l.b16 %v1082_v59 }
 0x12e   :  { %v989_v20 = vrot.slane %v972_v12, 2 }
 0x130   :  { %v991_v44 = vsel %vm990_vm13, %v989_v20, %v988_v2 }
 0x131   :  { %v994_v47 = vsel %vm993_vm14, %v992_v31, %v991_v44 }
 0x132   :  { %v995_v48 = vpack.c.b16 %v994_v47, %v994_v47 }
 0x134   :  { %997 = vst [vmem:[%s1628_s3] sm:$0xf] %v995_v48 }

</bundles_post_ra>
